<compile_context>
chip_gen: v5e
topology: v5e:2x2
jax: 0.10.0
libtpu: 0.0.40
codegen_flags: <defaults>
</compile_context>

<pallas_src>
import math

import jax
import jax.numpy as jnp
from jax.experimental import pallas as pl
from jax.experimental.pallas import tpu as pltpu

_NEG_BIG = -1e30  # pads the class axis; exp() underflows to exactly 0 in f32

# Keep the resident weight comfortably inside v7x's 32 MiB scoped / 64 MiB
# physical VMEM even if the pipeline double-buffers the (constant) block.
_WEIGHT_RESIDENT_BYTES = 12 * 1024 * 1024
# Guard for the streamed fallback: double-buffered (tk, N_pad) bf16 block.
_STREAM_WEIGHT_BYTES = 8 * 1024 * 1024


def _round_up(x, m):
    return (x + m - 1) // m * m


def _make_kernel(weight_resident: bool, tk: int):
    """Fused linear + softmax(dim=1); one (batch-tile, K-tile) grid step.

    x_ref:   [tm, tk]          f32 activation tile (cast to bf16 in-kernel)
    w_ref:   [D_pad, N_pad]    bf16 weight, VMEM-resident (sliced per K step)
             or [tk, N_pad]    bf16 streamed weight tile (fallback)
    b_ref:   [1, N_pad]        f32 bias (padded classes = -1e30 -> prob 0)
    o_ref:   [tm, N_pad]       f32 softmax probabilities (resident across K)
    acc_ref: [tm, N_pad]       f32 accumulator scratch
    """

    def kernel(x_ref, w_ref, b_ref, o_ref, acc_ref):
        k = pl.program_id(1)

        @pl.when(k == 0)
        def _init():
            # Fold the bias into the accumulator init (no per-step VALU add).
            acc_ref[...] = jnp.broadcast_to(b_ref[...], acc_ref.shape)

        x = x_ref[...].astype(jnp.bfloat16)
        if weight_resident:
            off = pl.multiple_of(k * tk, tk)
            w = w_ref[pl.ds(off, tk), :]     # slice the resident weight
        else:
            w = w_ref[...]                   # streamed tile
        acc_ref[...] += jnp.dot(x, w, preferred_element_type=jnp.float32)

        @pl.when(k == pl.num_programs(1) - 1)
        def _epilogue():
            logits = acc_ref[...]
            m = jnp.max(logits, axis=1, keepdims=True)
            e = jnp.exp(logits - m)          # padded cols -> exactly 0
            denom = jnp.sum(e, axis=1, keepdims=True)
            # Exact divide: epilogue runs once per batch tile, so it is free,
            # and Occlusion differences small probability deltas.
            o_ref[...] = (e / denom).astype(o_ref.dtype)

    return kernel


def make_wrapped_model(weight, bias, *, tm_max=512, tk_max=2048):
    """Builds a jitted forward(x_nchw) -> softmax probs [B, N].

    Pads/casts the parameters once (cached across the many Occlusion calls).
    weight: [D, N] f32, bias: [N] f32, D = C*H*W of the NCHW input.
    """
    D, N = weight.shape
    N_pad = _round_up(N, 128)                       # lane-dense class axis

    tk = min(tk_max, _round_up(D, 128))
    D_pad = _round_up(D, tk)
    weight_resident = D_pad * N_pad * 2 <= _WEIGHT_RESIDENT_BYTES
    if not weight_resident:
        # v7x VMEM guard for the streamed double-buffered weight block.
        tk_cap = max(128, (_STREAM_WEIGHT_BYTES // (4 * N_pad)) // 128 * 128)
        tk = min(tk, tk_cap)
        D_pad = _round_up(D, tk)

    # ---- one-time parameter pad/cast (hoisted out of the per-call path) ----
    w_p = jnp.pad(weight.astype(jnp.bfloat16),
                  ((0, D_pad - D), (0, N_pad - N)))
    b_p = jnp.pad(bias.astype(jnp.float32)[None, :],
                  ((0, 0), (0, N_pad - N)), constant_values=_NEG_BIG)

    kernel = _make_kernel(weight_resident, tk)

    @jax.jit
    def forward(x_nchw):
        B = x_nchw.shape[0]
        Dx = math.prod(x_nchw.shape[1:])
        if Dx != D:
            raise ValueError(f"flattened input dim {Dx} != weight dim {D}")

        # Batch tiling: big tiles for arithmetic intensity, but keep >= 2
        # batch blocks when possible so v7x's 2 TensorCores both get work.
        B8 = _round_up(B, 8)
        tm = min(tm_max, B8)
        if B8 >= 16 and B8 // tm < 2:
            tm = _round_up(B8 // 2, 8)
        B_pad = _round_up(B8, tm)

        # Activations stay f32 in HBM (cast to bf16 in-kernel); pad only when
        # the shapes are not already tile-aligned.
        # TODO(synk): CompilerParams(allow_input_fusion=...) could fuse this
        # pad into the pallas_call input when padding is needed.
        x_flat = x_nchw.reshape(B, Dx)
        if (B_pad, D_pad) != (B, Dx):
            x_p = jnp.pad(x_flat, ((0, B_pad - B), (0, D_pad - Dx)))
        else:
            x_p = x_flat

        nb = B_pad // tm
        nk = D_pad // tk
        grid = (nb, nk)

        if weight_resident:
            # Constant index map -> the weight is DMA'd into VMEM once for the
            # whole kernel, not once per batch tile.
            w_spec = pl.BlockSpec((D_pad, N_pad), lambda i, k: (0, 0))
            w_hbm_bytes = D_pad * N_pad * 2
            w_vmem = D_pad * N_pad * 2 * 2          # conservative (2 buffers)
        else:
            w_spec = pl.BlockSpec((tk, N_pad), lambda i, k: (k, 0))
            w_hbm_bytes = D_pad * N_pad * 2 * nb    # re-streamed per batch tile
            w_vmem = tk * N_pad * 2 * 2

        vmem_need = (w_vmem
                     + tm * tk * 4 * 2              # x tiles (double-buffered)
                     + tm * N_pad * 4 * 2           # out tiles
                     + tm * N_pad * 4               # accumulator scratch
                     + N_pad * 4 * 2)               # bias
        vmem_limit = int(min(96 * 1024 * 1024,
                             max(32 * 1024 * 1024, vmem_need * 5 // 4)))

        cost = pl.CostEstimate(
            flops=2 * B_pad * D_pad * N_pad,
            transcendentals=B_pad * N_pad,
            bytes_accessed=(B_pad * D_pad * 4      # f32 activations
                            + w_hbm_bytes
                            + N_pad * 4
                            + B_pad * N_pad * 4),  # f32 output
        )

        out = pl.pallas_call(
            kernel,
            out_shape=jax.ShapeDtypeStruct((B_pad, N_pad), jnp.float32),
            grid_spec=pltpu.PrefetchScalarGridSpec(
                num_scalar_prefetch=0,
                grid=grid,
                in_specs=[
                    pl.BlockSpec((tm, tk), lambda i, k: (i, k)),   # activations
                    w_spec,                                        # weight
                    pl.BlockSpec((1, N_pad), lambda i, k: (0, 0)), # bias
                ],
                out_specs=pl.BlockSpec((tm, N_pad), lambda i, k: (i, 0)),
                scratch_shapes=[pltpu.VMEM((tm, N_pad), jnp.float32)],
            ),
            compiler_params=pltpu.CompilerParams(
                dimension_semantics=("parallel", "arbitrary"),
                vmem_limit_bytes=vmem_limit,
            ),
            cost_estimate=cost,
        )(x_p, w_p, b_p)

        # Slice away batch / class padding (padded class probs are exactly 0;
        # padded batch rows are garbage-but-finite and must not be read).
        return out[:B, :N]

    return forward


if __name__ == "__main__":
    # Small shapes consistent with an NCHW image-classifier input.
    B, C, H, W = 2, 4, 16, 16
    N_CLS = 32
    D = C * H * W

    key = jax.random.PRNGKey(0)
    kx, kw, kb = jax.random.split(key, 3)

    x = jax.random.normal(kx, (B, C, H, W), dtype=jnp.float32)
    # Deterministic synthetic parameters for the wrapped model's linear head.
    # TODO(synk): the reference wraps an arbitrary nn.Module; a linear head
    # stands in for it here.
    weight = jax.random.normal(kw, (D, N_CLS), dtype=jnp.float32) * (1.0 / jnp.sqrt(D))
    bias = jax.random.normal(kb, (N_CLS,), dtype=jnp.float32) * 0.01

    forward = make_wrapped_model(weight, bias)
    probs = jax.block_until_ready(forward(x))

    # Reference with the same bf16-input / f32-accumulate numerics.
    ref_logits = jnp.dot(
        x.reshape(B, D).astype(jnp.bfloat16),
        weight.astype(jnp.bfloat16),
        preferred_element_type=jnp.float32,
    ) + bias
    ref = jax.nn.softmax(ref_logits, axis=1)

    assert probs.shape == (B, N_CLS)
    assert jnp.allclose(probs, ref, atol=2e-3, rtol=2e-2)
    assert jnp.allclose(jnp.sum(probs, axis=1), jnp.ones((B,)), atol=1e-3)

    print("KERNEL_OK")
</pallas_src>

<mosaic_0001>
module attributes {stable_mosaic.version = 11 : i64} {
  func.func @kernel(%arg0: i32, %arg1: i32, %arg2: memref<8x1024xf32, #tpu.memory_space<vmem>>, %arg3: memref<1024x128xbf16, #tpu.memory_space<vmem>>, %arg4: memref<1x128xf32, #tpu.memory_space<vmem>>, %arg5: memref<8x128xf32, #tpu.memory_space<vmem>>, %arg6: memref<8x128xf32, #tpu.memory_space<vmem>>) attributes {dimension_semantics = [#tpu.dimension_semantics<parallel>, #tpu.dimension_semantics<arbitrary>], iteration_bounds = array<i64: 1, 1>, scalar_prefetch = 0 : i64, scratch_operands = 1 : i64, tpu.core_type = #tpu.core_type<tc>, window_params = [{transform_indices = @transform_0, window_bounds = array<i64: 8, 1024>}, {pipeline_mode = #tpu.pipeline_mode<synchronous>, transform_indices = @transform_1, window_bounds = array<i64: 1024, 128>}, {pipeline_mode = #tpu.pipeline_mode<synchronous>, transform_indices = @transform_2, window_bounds = array<i64: 1, 128>}, {transform_indices = @transform_3, window_bounds = array<i64: 8, 128>}]} {
    %c0_i32 = arith.constant 0 : i32
    %0 = arith.cmpi eq, %arg1, %c0_i32 : i32
    %1 = arith.extui %0 : i1 to i32
    %c0_i32_0 = arith.constant 0 : i32
    %2 = arith.cmpi ne, %1, %c0_i32_0 : i32
    scf.if %2 {
      %c0_9 = arith.constant 0 : index
      %c0_10 = arith.constant 0 : index
      %16 = vector.load %arg4[%c0_9, %c0_10] : memref<1x128xf32, #tpu.memory_space<vmem>>, vector<1x128xf32>
      %17 = vector.shape_cast %16 : vector<1x128xf32> to vector<1x128xf32>
      %18 = vector.broadcast %17 : vector<1x128xf32> to vector<8x128xf32>
      %c0_11 = arith.constant 0 : index
      %c0_12 = arith.constant 0 : index
      %19 = vector.load %arg6[%c0_11, %c0_12] : memref<8x128xf32, #tpu.memory_space<vmem>>, vector<8x128xf32>
      tpu.vector_store %arg6[%c0_11, %c0_12], %18 {strides = array<i32>} : memref<8x128xf32, #tpu.memory_space<vmem>>, vector<8x128xf32>,
    } else {
    }
    %c0 = arith.constant 0 : index
    %c0_1 = arith.constant 0 : index
    %3 = vector.load %arg2[%c0, %c0_1] : memref<8x1024xf32, #tpu.memory_space<vmem>>, vector<8x1024xf32>
    %4 = arith.truncf %3 : vector<8x1024xf32> to vector<8x1024xbf16>
    %c1024_i32 = arith.constant 1024 : i32
    %5 = arith.muli %arg1, %c1024_i32 : i32
    %6 = tpu.assume_multiple %5, 1024 : i32
    %7 = arith.index_cast %6 : i32 to index
    %c0_2 = arith.constant 0 : index
    %8 = vector.load %arg3[%7, %c0_2] : memref<1024x128xbf16, #tpu.memory_space<vmem>>, vector<1024x128xbf16>
    %c0_3 = arith.constant 0 : index
    %c0_4 = arith.constant 0 : index
    %9 = vector.load %arg6[%c0_3, %c0_4] : memref<8x128xf32, #tpu.memory_space<vmem>>, vector<8x128xf32>
    %cst = arith.constant dense<0.000000e+00> : vector<8x128xf32>
    %10 = tpu.matmul %4, %8, %cst {dimension_numbers = #tpu.dot_dimension_numbers<[1], [0], [0], [1], [0, 0, 1, 1], [], []>} : vector<8x1024xbf16>, vector<1024x128xbf16>, vector<8x128xf32> -> vector<8x128xf32>
    %11 = arith.addf %9, %10 : vector<8x128xf32>
    %c0_5 = arith.constant 0 : index
    %c0_6 = arith.constant 0 : index
    %12 = vector.load %arg6[%c0_5, %c0_6] : memref<8x128xf32, #tpu.memory_space<vmem>>, vector<8x128xf32>
    tpu.vector_store %arg6[%c0_5, %c0_6], %11 {strides = array<i32>} : memref<8x128xf32, #tpu.memory_space<vmem>>, vector<8x128xf32>,
    %c0_i32_7 = arith.constant 0 : i32
    %13 = arith.cmpi eq, %arg1, %c0_i32_7 : i32
    %14 = arith.extui %13 : i1 to i32
    %c0_i32_8 = arith.constant 0 : i32
    %15 = arith.cmpi ne, %14, %c0_i32_8 : i32
    scf.if %15 {
      %c0_9 = arith.constant 0 : index
      %c0_10 = arith.constant 0 : index
      %16 = vector.load %arg6[%c0_9, %c0_10] : memref<8x128xf32, #tpu.memory_space<vmem>>, vector<8x128xf32>
      %cst_11 = arith.constant dense<0xFF800000> : vector<8xf32>
      %17 = vector.multi_reduction <maximumf>, %16, %cst_11 [1] : vector<8x128xf32> to vector<8xf32>
      %18 = vector.shape_cast %17 : vector<8xf32> to vector<8x1xf32>
      %19 = vector.broadcast %18 : vector<8x1xf32> to vector<8x128xf32>
      %20 = arith.subf %16, %19 : vector<8x128xf32>
      %21 = math.exp %20 : vector<8x128xf32>
      %cst_12 = arith.constant dense<0.000000e+00> : vector<8xf32>
      %22 = vector.multi_reduction <add>, %21, %cst_12 [1] : vector<8x128xf32> to vector<8xf32>
      %23 = vector.shape_cast %22 : vector<8xf32> to vector<8x1xf32>
      %24 = vector.broadcast %23 : vector<8x1xf32> to vector<8x128xf32>
      %25 = arith.divf %21, %24 : vector<8x128xf32>
      %c0_13 = arith.constant 0 : index
      %c0_14 = arith.constant 0 : index
      %26 = vector.load %arg5[%c0_13, %c0_14] : memref<8x128xf32, #tpu.memory_space<vmem>>, vector<8x128xf32>
      tpu.vector_store %arg5[%c0_13, %c0_14], %25 {strides = array<i32>} : memref<8x128xf32, #tpu.memory_space<vmem>>, vector<8x128xf32>,
    } else {
    }
    return
  }
  func.func @transform_0(%arg0: i32, %arg1: i32) -> (i32, i32) {
    %c0_i32 = arith.constant 0 : i32
    return %arg0, %arg1 : i32, i32
  }
  func.func @transform_1(%arg0: i32, %arg1: i32) -> (i32, i32) {
    %c0_i32 = arith.constant 0 : i32
    %c0_i32_0 = arith.constant 0 : i32
    %c0_i32_1 = arith.constant 0 : i32
    return %c0_i32, %c0_i32_0 : i32, i32
  }
  func.func @transform_2(%arg0: i32, %arg1: i32) -> (i32, i32) {
    %c0_i32 = arith.constant 0 : i32
    %c0_i32_0 = arith.constant 0 : i32
    %c0_i32_1 = arith.constant 0 : i32
    return %c0_i32, %c0_i32_0 : i32, i32
  }
  func.func @transform_3(%arg0: i32, %arg1: i32) -> (i32, i32) {
    %c0_i32 = arith.constant 0 : i32
    %c0_i32_0 = arith.constant 0 : i32
    return %arg0, %c0_i32 : i32, i32
  }
}

</mosaic_0001>

<bundles_post_ra>
// kernel: forward.1
= control target key start
LH: loop header
LB: loop body
LE: loop exit
PB: predicated region body
PF: predicated region fallthrough
CT: control target
= control target key end

     0   :  { %8 = vsyncpa [#allocation4], 0  ;;  %s1067_s15 = smov [#allocation3]   ;;  %s1068_s17 = smov 64   ;;  %s1123_s0 = inlined_call_operand.vmem [shape: f32[8,1024], index: 0, kind: input, shape index: {}]   ;;  %s1124_s1 = inlined_call_operand.hbm [shape: bf16[1024,128], index: 1, kind: input, shape index: {}]   ;;  %s1125_s2 = inlined_call_operand.vmem [shape: f32[1,128], index: 2, kind: input, shape index: {}]   ;;  %s1126_s3 = inlined_call_operand.vmem [shape: f32[8,128], index: 3, kind: output, shape index: {}]  }
   0x1   :  { %s15_s14 = sshll.u32 %s1124_s1, 4  ;;  %s17_s16 = sshll.u32 %s1067_s15, 4  ;;  %s16_s14 = int_to_ptr.hbm [resolvable:$true] %s15_s14  ;;  %s18_s16 = int_to_ptr.vmem [resolvable:$true] %s17_s16 }
   0x2   :  { %s1069_s18 = smov 4  }
   0x3   :  { %23 = dma.hbm_to_vmem [thread:$0]  %s16_s14, 8192, %s18_s16, [#allocation4], %s1068_s17, %s1068_s17, %s1069_s18  }
   0x4   :  { %1065 = dma.done.wait [#allocation4], 8192  }
   0x5   :  { %1066 = vsyncadd [#allocation4], 4294959104  ;;  %v976_v0 = vld [vmem:[#allocation3 + $0x38] sm:$0xff]  ;;  %v975_v4 = vld [vmem:[#allocation3 + $0x30] sm:$0xff] }
   0x6   :  { %v984_v1 = vld [vmem:[#allocation3 + $0x78] sm:$0xff]  ;;  %573 = vmatpush.bf16.msra.mxu0 %v976_v0  ;;  %v983_v5 = vld [vmem:[#allocation3 + $0x70] sm:$0xff]  ;;  %v974_v8 = vld [vmem:[#allocation3 + $0x28] sm:$0xff] }
   0x7   :  { %v992_v2 = vld [vmem:[#allocation3 + $0xb8] sm:$0xff]  ;;  %586 = vmatpush.bf16.msra.mxu1 %v984_v1  ;;  %v991_v6 = vld [vmem:[#allocation3 + $0xb0] sm:$0xff]  ;;  %v982_v9 = vld [vmem:[#allocation3 + $0x68] sm:$0xff] }
   0x8   :  { %v1000_v3 = vld [vmem:[#allocation3 + $0xf8] sm:$0xff]  ;;  %599 = vmatpush.bf16.msra.mxu2 %v992_v2  ;;  %v999_v7 = vld [vmem:[#allocation3 + $0xf0] sm:$0xff]  ;;  %v990_v10 = vld [vmem:[#allocation3 + $0xa8] sm:$0xff] }
   0x9   :  { %612 = vmatpush.bf16.msra.mxu3 %v1000_v3  ;;  %v998_v11 = vld [vmem:[#allocation3 + $0xe8] sm:$0xff]  ;;  %v973_v12 = vld [vmem:[#allocation3 + $0x20] sm:$0xff]  ;;  %v972_v16 = vld [vmem:[#allocation3 + $0x18] sm:$0xff] }
   0xa   :  { %574 = vmatpush.bf16.msra.mxu0 %v975_v4  ;;  %v981_v13 = vld [vmem:[#allocation3 + $0x60] sm:$0xff]  ;;  %v980_v17 = vld [vmem:[#allocation3 + $0x58] sm:$0xff]  ;;  %v971_v20 = vld [vmem:[#allocation3 + $0x10] sm:$0xff] }
   0xb   :  { %587 = vmatpush.bf16.msra.mxu1 %v983_v5  ;;  %v989_v14 = vld [vmem:[#allocation3 + $0xa0] sm:$0xff]  ;;  %v988_v18 = vld [vmem:[#allocation3 + $0x98] sm:$0xff]  ;;  %v979_v21 = vld [vmem:[#allocation3 + $0x50] sm:$0xff] }
   0xc   :  { %600 = vmatpush.bf16.msra.mxu2 %v991_v6  ;;  %v997_v15 = vld [vmem:[#allocation3 + $0xe0] sm:$0xff]  ;;  %v996_v19 = vld [vmem:[#allocation3 + $0xd8] sm:$0xff]  ;;  %v987_v22 = vld [vmem:[#allocation3 + $0x90] sm:$0xff] }
   0xd   :  { %613 = vmatpush.bf16.msra.mxu3 %v999_v7  ;;  %v995_v23 = vld [vmem:[#allocation3 + $0xd0] sm:$0xff]  ;;  %v970_v24 = vld [vmem:[#allocation3 + $0x8] sm:$0xff]  ;;  %v969_v28 = vld [vmem:[#allocation3] sm:$0xff] }
   0xe   :  { %575 = vmatpush.bf16.msra.mxu0 %v974_v8  ;;  %v978_v25 = vld [vmem:[#allocation3 + $0x48] sm:$0xff]  ;;  %v977_v29 = vld [vmem:[#allocation3 + $0x40] sm:$0xff]  ;;  %v1008_v32 = vld [vmem:[#allocation3 + $0x138] sm:$0xff] }
   0xf   :  { %588 = vmatpush.bf16.msra.mxu1 %v982_v9  ;;  %v986_v26 = vld [vmem:[#allocation3 + $0x88] sm:$0xff]  ;;  %v985_v30 = vld [vmem:[#allocation3 + $0x80] sm:$0xff]  ;;  %v41_v33 = vld [vmem:[%s1123_s0 + $0x10] sm:$0xff] }
  0x10   :  { %601 = vmatpush.bf16.msra.mxu2 %v990_v10  ;;  %v994_v27 = vld [vmem:[#allocation3 + $0xc8] sm:$0xff]  ;;  %v993_v31 = vld [vmem:[#allocation3 + $0xc0] sm:$0xff]  ;;  %v1016_v35 = vld [vmem:[#allocation3 + $0x178] sm:$0xff]  ;;  %v49_v40 = vpack.c.bf16 %v41_v33, %v41_v33 }
  0x11   :  { %614 = vmatpush.bf16.msra.mxu3 %v998_v11  ;;  %v39_v34 = vld [vmem:[%s1123_s0] sm:$0xff]  ;;  %v42_v36 = vld [vmem:[%s1123_s0 + $0x18] sm:$0xff]  ;;  %v40_v37 = vld [vmem:[%s1123_s0 + $0x8] sm:$0xff] }
  0x12   :  { %576 = vmatpush.bf16.msra.mxu0 %v973_v12  ;;  %v1024_v38 = vld [vmem:[#allocation3 + $0x1b8] sm:$0xff]  ;;  %v47_v41 = vpack.c.bf16 %v39_v34, %v39_v34  ;;  %v50_v42 = vpack.c.bf16 %v42_v36, %v42_v36  ;;  %v48_v43 = vpack.c.bf16 %v40_v37, %v40_v37  ;;  %v1007_v44 = vld [vmem:[#allocation3 + $0x130] sm:$0xff]  ;;  %v1006_v48 = vld [vmem:[#allocation3 + $0x128] sm:$0xff] }
  0x13   :  { %589 = vmatpush.bf16.msra.mxu1 %v981_v13  ;;  %v1032_v39 = vld [vmem:[#allocation3 + $0x1f8] sm:$0xff]  ;;  %v1015_v45 = vld [vmem:[#allocation3 + $0x170] sm:$0xff]  ;;  %v1014_v49 = vld [vmem:[#allocation3 + $0x168] sm:$0xff] }
  0x14   :  { %602 = vmatpush.bf16.msra.mxu2 %v989_v14  ;;  %v1023_v46 = vld [vmem:[#allocation3 + $0x1b0] sm:$0xff]  ;;  %v1022_v50 = vld [vmem:[#allocation3 + $0x1a8] sm:$0xff]  ;;  %v1005_v52 = vld [vmem:[#allocation3 + $0x120] sm:$0xff] }
  0x15   :  { %615 = vmatpush.bf16.msra.mxu3 %v997_v15  ;;  %v1031_v47 = vld [vmem:[#allocation3 + $0x1f0] sm:$0xff]  ;;  %v1030_v51 = vld [vmem:[#allocation3 + $0x1e8] sm:$0xff]  ;;  %v1013_v53 = vld [vmem:[#allocation3 + $0x160] sm:$0xff] }
  0x16   :  { %577 = vmatpush.bf16.msra.mxu0 %v972_v16  ;;  %v1021_v54 = vld [vmem:[#allocation3 + $0x1a0] sm:$0xff]  ;;  %v1004_v56 = vld [vmem:[#allocation3 + $0x118] sm:$0xff]  ;;  %v1003_v60 = vld [vmem:[#allocation3 + $0x110] sm:$0xff] }
  0x17   :  { %590 = vmatpush.bf16.msra.mxu1 %v980_v17  ;;  %v1029_v55 = vld [vmem:[#allocation3 + $0x1e0] sm:$0xff]  ;;  %v1012_v57 = vld [vmem:[#allocation3 + $0x158] sm:$0xff]  ;;  %v1011_v61 = vld [vmem:[#allocation3 + $0x150] sm:$0xff] }
  0x18   :  { %603 = vmatpush.bf16.msra.mxu2 %v988_v18  ;;  %v1020_v58 = vld [vmem:[#allocation3 + $0x198] sm:$0xff]  ;;  %v1019_v62 = vld [vmem:[#allocation3 + $0x190] sm:$0xff]  ;;  %v1002_v0 = vld [vmem:[#allocation3 + $0x108] sm:$0xff] }
  0x19   :  { %616 = vmatpush.bf16.msra.mxu3 %v996_v19  ;;  %v1028_v59 = vld [vmem:[#allocation3 + $0x1d8] sm:$0xff]  ;;  %v1027_v63 = vld [vmem:[#allocation3 + $0x1d0] sm:$0xff]  ;;  %v1010_v1 = vld [vmem:[#allocation3 + $0x148] sm:$0xff] }
  0x1a   :  { %578 = vmatpush.bf16.msra.mxu0 %v971_v20  ;;  %v1018_v2 = vld [vmem:[#allocation3 + $0x188] sm:$0xff]  ;;  %v1001_v4 = vld [vmem:[#allocation3 + $0x100] sm:$0xff]  ;;  %v45_v10 = vld [vmem:[%s1123_s0 + $0x30] sm:$0xff] }
  0x1b   :  { %591 = vmatpush.bf16.msra.mxu1 %v979_v21  ;;  %v1026_v3 = vld [vmem:[#allocation3 + $0x1c8] sm:$0xff]  ;;  %v1009_v5 = vld [vmem:[#allocation3 + $0x140] sm:$0xff]  ;;  %v46_v11 = vld [vmem:[%s1123_s0 + $0x38] sm:$0xff]  ;;  %v53_v14 = vpack.c.bf16 %v45_v10, %v45_v10 }
  0x1c   :  { %604 = vmatpush.bf16.msra.mxu2 %v987_v22  ;;  %v1017_v6 = vld [vmem:[#allocation3 + $0x180] sm:$0xff]  ;;  %v44_v8 = vld [vmem:[%s1123_s0 + $0x28] sm:$0xff]  ;;  %v54_v15 = vpack.c.bf16 %v46_v11, %v46_v11 }
  0x1d   :  { %617 = vmatpush.bf16.msra.mxu3 %v995_v23  ;;  %v43_v7 = vld [vmem:[%s1123_s0 + $0x20] sm:$0xff]  ;;  %v52_v13 = vpack.c.bf16 %v44_v8, %v44_v8 }
  0x1e   :  { %579 = vmatpush.bf16.msra.mxu0 %v970_v24  ;;  %v1025_v9 = vld [vmem:[#allocation3 + $0x1c0] sm:$0xff]  ;;  %v51_v12 = vpack.c.bf16 %v43_v7, %v43_v7 }
  0x1f   :  { %592 = vmatpush.bf16.msra.mxu1 %v978_v25  ;;  %v1036_v36 = vld [vmem:[%s1125_s2] ss:$0 sm:$0xff] }
  0x20   :  { %605 = vmatpush.bf16.msra.mxu2 %v986_v26 }
  0x21   :  { %618 = vmatpush.bf16.msra.mxu3 %v994_v27 }
  0x22   :  { %580 = vmatpush.bf16.msra.mxu0 %v969_v28 }
  0x23   :  { %593 = vmatpush.bf16.msra.mxu1 %v977_v29 }
  0x24   :  { %606 = vmatpush.bf16.msra.mxu2 %v985_v30 }
  0x25   :  { %619 = vmatpush.bf16.msra.mxu3 %v993_v31  ;;  %581 = vmatmul.bf16.vlgmr.msra.gmra.mxu0 %v47_v41 }
  0x26   :  { %625 = vmatpush.bf16.msrb.mxu0 %v1008_v32  ;;  %594 = vmatmul.bf16.vlgmr.msra.gmra.mxu1 %v48_v43 }
  0x27   :  { %638 = vmatpush.bf16.msrb.mxu1 %v1016_v35  ;;  %607 = vmatmul.bf16.vlgmr.msra.gmra.mxu2 %v49_v40 }
  0x28   :  { %651 = vmatpush.bf16.msrb.mxu2 %v1024_v38  ;;  %620 = vmatmul.bf16.vlgmr.msra.gmra.mxu3 %v50_v42 }
  0x29   :  { %664 = vmatpush.bf16.msrb.mxu3 %v1032_v39 }
  0x2a   :  { %626 = vmatpush.bf16.msrb.mxu0 %v1007_v44 }
  0x2b   :  { %639 = vmatpush.bf16.msrb.mxu1 %v1015_v45 }
  0x2c   :  { %652 = vmatpush.bf16.msrb.mxu2 %v1023_v46 }
  0x2d   :  { %665 = vmatpush.bf16.msrb.mxu3 %v1031_v47 }
  0x2e   :  { %627 = vmatpush.bf16.msrb.mxu0 %v1006_v48 }
  0x2f   :  { %640 = vmatpush.bf16.msrb.mxu1 %v1014_v49 }
  0x30   :  { %653 = vmatpush.bf16.msrb.mxu2 %v1022_v50 }
  0x31   :  { %666 = vmatpush.bf16.msrb.mxu3 %v1030_v51 }
  0x32   :  { %628 = vmatpush.bf16.msrb.mxu0 %v1005_v52 }
  0x33   :  { %641 = vmatpush.bf16.msrb.mxu1 %v1013_v53 }
  0x34   :  { %654 = vmatpush.bf16.msrb.mxu2 %v1021_v54 }
  0x35   :  { %667 = vmatpush.bf16.msrb.mxu3 %v1029_v55 }
  0x36   :  { %629 = vmatpush.bf16.msrb.mxu0 %v1004_v56 }
  0x37   :  { %642 = vmatpush.bf16.msrb.mxu1 %v1012_v57 }
  0x38   :  { %655 = vmatpush.bf16.msrb.mxu2 %v1020_v58 }
  0x39   :  { %668 = vmatpush.bf16.msrb.mxu3 %v1028_v59 }
  0x3a   :  { %630 = vmatpush.bf16.msrb.mxu0 %v1003_v60 }
  0x3b   :  { %643 = vmatpush.bf16.msrb.mxu1 %v1011_v61 }
  0x3c   :  { %656 = vmatpush.bf16.msrb.mxu2 %v1019_v62 }
  0x3d   :  { %669 = vmatpush.bf16.msrb.mxu3 %v1027_v63 }
  0x3e   :  { %631 = vmatpush.bf16.msrb.mxu0 %v1002_v0 }
  0x3f   :  { %644 = vmatpush.bf16.msrb.mxu1 %v1010_v1 }
  0x40   :  { %657 = vmatpush.bf16.msrb.mxu2 %v1018_v2 }
  0x41   :  { %670 = vmatpush.bf16.msrb.mxu3 %v1026_v3 }
  0x42   :  { %632 = vmatpush.bf16.msrb.mxu0 %v1001_v4 }
  0x43   :  { %645 = vmatpush.bf16.msrb.mxu1 %v1009_v5 }
  0x44   :  { %658 = vmatpush.bf16.msrb.mxu2 %v1017_v6 }
  0x45   :  { %671 = vmatpush.bf16.msrb.mxu3 %v1025_v9  ;;  %633 = vmatmul.bf16.vlgmr.msrb.gmra.mxu0 %v51_v12 }
  0x46   :  { %646 = vmatmul.bf16.vlgmr.msrb.gmra.mxu1 %v52_v13 }
  0x47   :  { %659 = vmatmul.bf16.vlgmr.msrb.gmra.mxu2 %v53_v14 }
  0x48   :  { %672 = vmatmul.bf16.vlgmr.msrb.gmra.mxu3 %v54_v15 }
  0xa2   :  { %v582_v16 = vpop.f32.mrf.mxu0 }
  0xa3   :  { %v595_v17 = vpop.f32.mrf.mxu1 }
  0xa4   :  { %v596_v24 = vadd.f32 %v595_v17, %v582_v16 }
  0xaa   :  { %v608_v18 = vpop.f32.mrf.mxu2  ;;  %v584_v20 = vpop.f32.mrf.mxu0 }
  0xab   :  { %v621_v19 = vpop.f32.mrf.mxu3  ;;  %v597_v21 = vpop.f32.mrf.mxu1  ;;  %v609_v25 = vadd.f32 %v608_v18, %v596_v24 }
  0xad   :  { %v622_v26 = vadd.f32 %v621_v19, %v609_v25 }
  0xb2   :  { %v610_v22 = vpop.f32.mrf.mxu2 }
  0xb3   :  { %v623_v23 = vpop.f32.mrf.mxu3 }
  0xc2   :  { %v634_v27 = vpop.f32.mrf.mxu0 }
  0xc3   :  { %v647_v28 = vpop.f32.mrf.mxu1  ;;  %v635_v29 = vadd.f32 %v634_v27, %v622_v26 }
  0xc5   :  { %v648_v30 = vadd.f32 %v647_v28, %v635_v29 }
  0xca   :  { %v660_v31 = vpop.f32.mrf.mxu2  ;;  %v636_v34 = vpop.f32.mrf.mxu0 }
  0xcb   :  { %v673_v32 = vpop.f32.mrf.mxu3  ;;  %v661_v33 = vadd.f32 %v660_v31, %v648_v30  ;;  %v649_v35 = vpop.f32.mrf.mxu1 }
  0xcd   :  { %v674_v37 = vadd.f32 %v673_v32, %v661_v33 }
  0xcf   :  { %v677_v38 = vadd.f32 %v1036_v36, %v674_v37 }
  0xd1   :  { %683 = vmax.xlane.f32.xlu0 %v677_v38 }
  0xd2   :  { %v662_v39 = vpop.f32.mrf.mxu2 }
  0xd3   :  { %v675_v40 = vpop.f32.mrf.mxu3 }
 0x144   :  { %v684_v41 = vpop.xlane.xlu0 %683 }
 0x145   :  { %v685_v42 = vsub.f32 %v677_v38, %v684_v41 }
 0x147   :  { %v686_v43 = vmul.f32 1.442695, %v685_v42 }
 0x149   :  { %1037 = vpow2.f32 %v686_v43 }
 0x14f   :  { %v1038_v44 = vpop.eup %1037 }
 0x150   :  { %688 = vadd.xlane.f32.xlu0 %v1038_v44 }
 0x1c3   :  { %v689_v45 = vpop.xlane.xlu0 %688 }
 0x1c4   :  { %1039 = vrcp.f32 %v689_v45  ;;  %v701_v49 = vand.u32 2147483648, %v689_v45  ;;  %v699_v51 = vand.u32 2147483647, %v689_v45  ;;  %vm695_vm1 = vweird.f32 %v689_v45 }
 0x1c6   :  { %v702_v53 = vor.u32 1.1754944e-38, %v701_v49  ;;  %vm700_vm3 = vcmp.eq.f32.partialorder %v699_v51, 8.507059e+37 }
 0x1ca   :  { %v1040_v46 = vpop.eup %1039 }
 0x1cb   :  { %v691_v47 = vmul.f32 %v1040_v46, %v689_v45  ;;  %vm696_vm0 = vweird.f32 %v1040_v46 }
 0x1cc   :  { %vm697_vm2 = vmor %vm695_vm1, %vm696_vm0 }
 0x1cd   :  { %v692_v48 = vsub.f32 1.0, %v691_v47 }
 0x1cf   :  { %v693_v50 = vmul.f32 %v1040_v46, %v692_v48 }
 0x1d1   :  { %v694_v52 = vadd.f32 %v1040_v46, %v693_v50 }
 0x1d3   :  { %v698_v54 = vsel %vm697_vm2, %v1040_v46, %v694_v52 }
 0x1d4   :  { %v703_v55 = vsel %vm700_vm3, %v702_v53, %v698_v54 }
 0x1d5   :  { %v704_v56 = vmul.f32 %v1038_v44, %v703_v55 }
 0x1d7   :  { %705 = vst [vmem:[%s1126_s3] sm:$0xff] %v704_v56 }
 0x1d8   :  { %710 = vsyncpa [#allocation4], 1 }

</bundles_post_ra>
